<compile_context>
chip_gen: v7x
topology: tpu7x:2x2x1
jax: 0.10.0
libtpu: 0.0.40
codegen_flags: <defaults>
</compile_context>

<pallas_src>
import functools

import jax
import jax.numpy as jnp
from jax.experimental import pallas as pl
from jax.experimental.pallas import tpu as pltpu

LABEL_SMOOTHING = True
LABEL_SMOOTHING_VALUE = 0.1
IGNORE_INDEX = -100  # PyTorch nn.CrossEntropyLoss default


def _round_up(x: int, m: int) -> int:
    return ((x + m - 1) // m) * m


def _ce_kernel(logits_ref, targets_ref, out_ref, *, n_valid, eps, tile_n, c,
               chunk_c, ignore_index, targets_whole):
    i = pl.program_id(0)

    if targets_whole:
        # Whole targets array lives in VMEM (DMA'd once); slice this tile's rows.
        start = pl.multiple_of(i * tile_n, tile_n)
        t = targets_ref[pl.ds(start, tile_n), :]          # (TILE_N, 1) int32
    else:
        t = targets_ref[...]                              # (TILE_N, 1) int32

    f32 = jnp.float32
    m = jnp.full((tile_n, 1), -jnp.inf, dtype=f32)        # running row max
    l = jnp.zeros((tile_n, 1), dtype=f32)                 # running sum exp(x - m)
    xt = jnp.zeros((tile_n, 1), dtype=f32)                # x[target]
    s = jnp.zeros((tile_n, 1), dtype=f32)                 # running row sum (smoothing)

    # One fused pass over C in lane chunks: the tile is read from VMEM once and
    # only chunk-sized f32 temporaries exist (no full-tile upcast / iota).
    for off in range(0, c, chunk_c):
        w = min(chunk_c, c - off)
        xc = logits_ref[:, off:off + w].astype(f32)       # chunk-sized f32 temp
        m_new = jnp.maximum(m, jnp.max(xc, axis=-1, keepdims=True))
        l = l * jnp.exp(m - m_new) + jnp.sum(jnp.exp(xc - m_new), axis=-1,
                                             keepdims=True)
        m = m_new
        col = off + jax.lax.broadcasted_iota(jnp.int32, (1, w), 1)   # (1, w)
        xt = xt + jnp.sum(jnp.where(col == t, xc, 0.0), axis=-1, keepdims=True)
        if eps != 0.0:
            s = s + jnp.sum(xc, axis=-1, keepdims=True)

    # per_sample = logsumexp - (1-eps)*x[target] - (eps/C)*sum_c(x)
    per_sample = m + jnp.log(l) - (1.0 - eps) * xt
    if eps != 0.0:
        per_sample = per_sample - (eps / c) * s           # eps/C folded once

    # Mask padded rows of the last (partial) tile and ignored targets.
    row = jax.lax.broadcasted_iota(jnp.int32, (tile_n, 1), 0)
    valid = ((i * tile_n + row) < n_valid) & (t != ignore_index)
    partial = jnp.sum(jnp.where(valid, per_sample, 0.0))

    # Lane-dense (8,128) block per tile -> unmasked vst.
    out_ref[...] = jnp.full((8, 128), partial, dtype=jnp.float32)


def cross_entropy_loss(
    logits: jax.Array,
    targets: jax.Array,
    *,
    label_smoothing: bool = LABEL_SMOOTHING,
    label_smoothing_value: float = LABEL_SMOOTHING_VALUE,
    ignore_index: int = IGNORE_INDEX,
    tile_n: int | None = None,
    chunk_c: int | None = None,
    vmem_tile_bytes: int = 2 * 1024 * 1024,
    buffer_count: int | None = None,
    targets_untiled: bool | None = None,
) -> jax.Array:
    """logits: (N, C) float, targets: (N,) int class indices -> scalar f32."""
    n, c = logits.shape
    eps = float(label_smoothing_value) if label_smoothing else 0.0

    itemsize = jnp.dtype(logits.dtype).itemsize
    sub = 8 if itemsize >= 4 else (16 if itemsize == 2 else 32)

    # Clear error instead of a compile OOM for enormous class counts.
    if 2 * sub * c * itemsize > 40 * 1024 * 1024:
        raise ValueError(
            f"C={c} with dtype {logits.dtype} is too large for a single "
            "row-group tile; a streaming-C kernel is required (not implemented).")

    if tile_n is None:
        tile_n = vmem_tile_bytes // max(1, c * itemsize)
        tile_n = min(tile_n, 4096)                 # bound per-chunk f32 temps
    tile_n = int(tile_n)
    if n > sub:
        # Ensure >= 2 grid steps so the "parallel" axis can use both v7x cores.
        tile_n = min(tile_n, _round_up(-(-n // 2), sub))
    tile_n = min(tile_n, _round_up(n, sub))
    tile_n = max(sub, (tile_n // sub) * sub)

    num_tiles = int(pl.cdiv(n, tile_n))
    n_pad = num_tiles * tile_n

    # Lane-chunk width for the fused pass (bounds in-kernel f32 temporaries).
    if chunk_c is None:
        chunk_c = (131072 // max(tile_n, 1)) // 128 * 128
        chunk_c = max(128, min(1024, chunk_c))
    chunk_c = int(max(1, min(chunk_c, c)))

    # Targets: one untiled DMA when small enough, else per-tile blocks.
    if targets_untiled is None:
        targets_untiled = n_pad <= 4096
    t_i32 = targets.astype(jnp.int32)
    if targets_untiled:
        t_pad = jnp.pad(t_i32, (0, n_pad - n), constant_values=ignore_index)
        targets2d = t_pad.reshape(n_pad, 1)
        targets_spec = pl.BlockSpec((n_pad, 1), lambda i: (0, 0))
    else:
        targets2d = t_i32.reshape(n, 1)
        targets_spec = pl.BlockSpec((tile_n, 1), lambda i: (i, 0))

    if buffer_count is not None and buffer_count != 2:
        logits_spec = pl.BlockSpec((tile_n, c), lambda i: (i, 0),
                                   pipeline_mode=pl.Buffered(buffer_count))
    else:
        logits_spec = pl.BlockSpec((tile_n, c), lambda i: (i, 0))

    tile_bytes = tile_n * c * itemsize
    vmem_limit = int(min(64 * 1024 * 1024, max(32 * 1024 * 1024, 4 * tile_bytes)))

    kernel = functools.partial(
        _ce_kernel, n_valid=n, eps=eps, tile_n=tile_n, c=c, chunk_c=chunk_c,
        ignore_index=ignore_index, targets_whole=bool(targets_untiled))

    out = pl.pallas_call(
        kernel,
        out_shape=jax.ShapeDtypeStruct((num_tiles * 8, 128), jnp.float32),
        grid_spec=pltpu.PrefetchScalarGridSpec(
            num_scalar_prefetch=0,
            grid=(num_tiles,),
            in_specs=[logits_spec, targets_spec],
            out_specs=pl.BlockSpec((8, 128), lambda i: (i, 0)),
        ),
        compiler_params=pltpu.CompilerParams(
            dimension_semantics=("parallel",),
            vmem_limit_bytes=vmem_limit,
        ),
    )(logits, targets2d)

    partials = out.reshape(num_tiles, 8, 128)[:, 0, 0]   # one sum per tile
    total = jnp.sum(partials)
    denom = jnp.sum((t_i32 != ignore_index).astype(jnp.float32))
    return total / denom


def _ref_loss(logits, targets, eps, ignore_index=IGNORE_INDEX):
    logits = logits.astype(jnp.float32)
    logp = jax.nn.log_softmax(logits, axis=-1)
    valid = targets != ignore_index
    safe_t = jnp.where(valid, targets, 0).astype(jnp.int32)
    nll = -jnp.take_along_axis(logp, safe_t[:, None], axis=-1)[:, 0]
    smooth = -jnp.mean(logp, axis=-1)
    per = (1.0 - eps) * nll + eps * smooth
    return jnp.sum(jnp.where(valid, per, 0.0)) / jnp.sum(valid)


if __name__ == "__main__":
    key = jax.random.PRNGKey(0)
    k1, k2, k3, k4, k5, k6, k7, k8 = jax.random.split(key, 8)

    # Case 1: multi-tile with a partial last tile, explicit tile_n.
    N1, C1 = 100, 128
    logits1 = jax.random.normal(k1, (N1, C1), dtype=jnp.float32)
    targets1 = jax.random.randint(k2, (N1,), 0, C1, dtype=jnp.int32)
    ref1 = _ref_loss(logits1, targets1, LABEL_SMOOTHING_VALUE)
    loss1 = cross_entropy_loss(logits1, targets1, tile_n=32)
    jax.block_until_ready(loss1)
    assert jnp.allclose(loss1, ref1, atol=1e-5, rtol=1e-5), (loss1, ref1)

    # Case 2: auto tile size (>=2 tiles enforced) + untiled-targets path.
    loss2 = cross_entropy_loss(logits1, targets1)
    jax.block_until_ready(loss2)
    assert jnp.allclose(loss2, ref1, atol=1e-5, rtol=1e-5), (loss2, ref1)

    # Case 3: per-tile targets fallback path.
    loss3 = cross_entropy_loss(logits1, targets1, tile_n=32, targets_untiled=False)
    jax.block_until_ready(loss3)
    assert jnp.allclose(loss3, ref1, atol=1e-5, rtol=1e-5), (loss3, ref1)

    # Case 4: bf16 logits stay bf16 in HBM; per-chunk upcast inside the kernel.
    N4, C4 = 64, 256
    logits4 = jax.random.normal(k3, (N4, C4), dtype=jnp.float32).astype(jnp.bfloat16)
    targets4 = jax.random.randint(k4, (N4,), 0, C4, dtype=jnp.int32)
    ref4 = _ref_loss(logits4, targets4, LABEL_SMOOTHING_VALUE)
    loss4 = cross_entropy_loss(logits4, targets4, tile_n=16)
    jax.block_until_ready(loss4)
    assert jnp.allclose(loss4, ref4, atol=1e-4, rtol=1e-4), (loss4, ref4)

    # Case 5: multi-chunk fused pass with a ragged last chunk (C=300, chunk=128).
    N5, C5 = 24, 300
    logits5 = jax.random.normal(k5, (N5, C5), dtype=jnp.float32)
    targets5 = jax.random.randint(k6, (N5,), 0, C5, dtype=jnp.int32)
    ref5 = _ref_loss(logits5, targets5, LABEL_SMOOTHING_VALUE)
    loss5 = cross_entropy_loss(logits5, targets5, chunk_c=128)
    jax.block_until_ready(loss5)
    assert jnp.allclose(loss5, ref5, atol=1e-5, rtol=1e-5), (loss5, ref5)

    # Case 6: PyTorch-default ignore_index=-100 handling (no smoothing).
    N6, C6 = 32, 128
    logits6 = jax.random.normal(k7, (N6, C6), dtype=jnp.float32)
    targets6 = jax.random.randint(k8, (N6,), 0, C6, dtype=jnp.int32)
    targets6 = targets6.at[3].set(-100).at[17].set(-100)
    ref6 = _ref_loss(logits6, targets6, 0.0)
    loss6 = cross_entropy_loss(logits6, targets6, label_smoothing=False)
    jax.block_until_ready(loss6)
    assert jnp.allclose(loss6, ref6, atol=1e-5, rtol=1e-5), (loss6, ref6)

    print("KERNEL_OK")
</pallas_src>

<mosaic_0001>
module attributes {stable_mosaic.version = 11 : i64} {
  func.func @_ce_kernel(%arg0: i32, %arg1: memref<32x128xf32, #tpu.memory_space<vmem>>, %arg2: memref<128x1xi32, #tpu.memory_space<vmem>>, %arg3: memref<8x128xf32, #tpu.memory_space<vmem>>) attributes {dimension_semantics = [#tpu.dimension_semantics<parallel>], iteration_bounds = array<i64: 4>, scalar_prefetch = 0 : i64, scratch_operands = 0 : i64, tpu.core_type = #tpu.core_type<tc>, window_params = [{transform_indices = @transform_0, window_bounds = array<i64: 32, 128>}, {pipeline_mode = #tpu.pipeline_mode<synchronous>, transform_indices = @transform_1, window_bounds = array<i64: 128, 1>}, {transform_indices = @transform_2, window_bounds = array<i64: 8, 128>}]} {
    %c32_i32 = arith.constant 32 : i32
    %0 = arith.muli %arg0, %c32_i32 : i32
    %1 = tpu.assume_multiple %0, 32 : i32
    %2 = arith.index_cast %1 : i32 to index
    %c0 = arith.constant 0 : index
    %3 = vector.load %arg2[%2, %c0] : memref<128x1xi32, #tpu.memory_space<vmem>>, vector<32x1xi32>
    %cst = arith.constant 0xFF800000 : f32
    %4 = vector.broadcast %cst : f32 to vector<32x1xf32>
    %cst_0 = arith.constant 0.000000e+00 : f32
    %5 = vector.broadcast %cst_0 : f32 to vector<32x1xf32>
    %cst_1 = arith.constant 0.000000e+00 : f32
    %6 = vector.broadcast %cst_1 : f32 to vector<32x1xf32>
    %cst_2 = arith.constant 0.000000e+00 : f32
    %7 = vector.broadcast %cst_2 : f32 to vector<32x1xf32>
    %c0_3 = arith.constant 0 : index
    %c0_4 = arith.constant 0 : index
    %8 = vector.load %arg1[%c0_3, %c0_4] : memref<32x128xf32, #tpu.memory_space<vmem>>, vector<32x128xf32>
    %cst_5 = arith.constant dense<0xFF800000> : vector<32xf32>
    %9 = vector.multi_reduction <maximumf>, %8, %cst_5 [1] : vector<32x128xf32> to vector<32xf32>
    %10 = vector.shape_cast %9 : vector<32xf32> to vector<32x1xf32>
    %11 = arith.maximumf %4, %10 : vector<32x1xf32>
    %12 = arith.subf %4, %11 : vector<32x1xf32>
    %13 = math.exp %12 : vector<32x1xf32>
    %14 = arith.mulf %5, %13 : vector<32x1xf32>
    %15 = vector.broadcast %11 : vector<32x1xf32> to vector<32x128xf32>
    %16 = arith.subf %8, %15 : vector<32x128xf32>
    %17 = math.exp %16 : vector<32x128xf32>
    %cst_6 = arith.constant dense<0.000000e+00> : vector<32xf32>
    %18 = vector.multi_reduction <add>, %17, %cst_6 [1] : vector<32x128xf32> to vector<32xf32>
    %19 = vector.shape_cast %18 : vector<32xf32> to vector<32x1xf32>
    %20 = arith.addf %14, %19 : vector<32x1xf32>
    %21 = tpu.iota {dimensions = array<i32: 1>} : vector<1x128xi32>
    %c0_i32 = arith.constant 0 : i32
    %22 = vector.broadcast %c0_i32 : i32 to vector<1x128xi32>
    %23 = arith.addi %22, %21 : vector<1x128xi32>
    %24 = vector.broadcast %23 : vector<1x128xi32> to vector<32x128xi32>
    %25 = vector.broadcast %3 : vector<32x1xi32> to vector<32x128xi32>
    %26 = arith.cmpi eq, %24, %25 : vector<32x128xi32>
    %cst_7 = arith.constant 0.000000e+00 : f32
    %27 = vector.broadcast %cst_7 : f32 to vector<32x128xf32>
    %28 = arith.select %26, %8, %27 : vector<32x128xi1>, vector<32x128xf32>
    %cst_8 = arith.constant dense<0.000000e+00> : vector<32xf32>
    %29 = vector.multi_reduction <add>, %28, %cst_8 [1] : vector<32x128xf32> to vector<32xf32>
    %30 = vector.shape_cast %29 : vector<32xf32> to vector<32x1xf32>
    %31 = arith.addf %6, %30 : vector<32x1xf32>
    %cst_9 = arith.constant dense<0.000000e+00> : vector<32xf32>
    %32 = vector.multi_reduction <add>, %8, %cst_9 [1] : vector<32x128xf32> to vector<32xf32>
    %33 = vector.shape_cast %32 : vector<32xf32> to vector<32x1xf32>
    %34 = arith.addf %7, %33 : vector<32x1xf32>
    %35 = math.log %20 : vector<32x1xf32>
    %36 = arith.addf %11, %35 : vector<32x1xf32>
    %cst_10 = arith.constant 0.899999976 : f32
    %37 = vector.broadcast %cst_10 : f32 to vector<32x1xf32>
    %38 = arith.mulf %37, %31 : vector<32x1xf32>
    %39 = arith.subf %36, %38 : vector<32x1xf32>
    %cst_11 = arith.constant 7.812500e-04 : f32
    %40 = vector.broadcast %cst_11 : f32 to vector<32x1xf32>
    %41 = arith.mulf %40, %34 : vector<32x1xf32>
    %42 = arith.subf %39, %41 : vector<32x1xf32>
    %43 = tpu.iota {dimensions = array<i32: 0>} : vector<32x1xi32>
    %c32_i32_12 = arith.constant 32 : i32
    %44 = arith.muli %arg0, %c32_i32_12 : i32
    %45 = vector.broadcast %44 : i32 to vector<32x1xi32>
    %46 = arith.addi %45, %43 : vector<32x1xi32>
    %c100_i32 = arith.constant 100 : i32
    %47 = vector.broadcast %c100_i32 : i32 to vector<32x1xi32>
    %48 = arith.cmpi slt, %46, %47 : vector<32x1xi32>
    %c-100_i32 = arith.constant -100 : i32
    %49 = vector.broadcast %c-100_i32 : i32 to vector<32x1xi32>
    %50 = arith.cmpi ne, %3, %49 : vector<32x1xi32>
    %51 = arith.andi %48, %50 : vector<32x1xi1>
    %cst_13 = arith.constant 0.000000e+00 : f32
    %52 = vector.broadcast %cst_13 : f32 to vector<32x1xf32>
    %53 = arith.select %51, %42, %52 : vector<32x1xi1>, vector<32x1xf32>
    %54 = vector.shape_cast %53 : vector<32x1xf32> to vector<1x32x1xf32>
    %cst_14 = arith.constant dense<0.000000e+00> : vector<1xf32>
    %55 = vector.multi_reduction <add>, %54, %cst_14 [1, 2] : vector<1x32x1xf32> to vector<1xf32>
    %56 = vector.shape_cast %55 : vector<1xf32> to vector<1x1x1xf32>
    %57 = vector.extract %56[0, 0, 0] : f32 from vector<1x1x1xf32>
    %58 = vector.broadcast %57 : f32 to vector<8x128xf32>
    %c0_15 = arith.constant 0 : index
    %c0_16 = arith.constant 0 : index
    %59 = vector.load %arg3[%c0_15, %c0_16] : memref<8x128xf32, #tpu.memory_space<vmem>>, vector<8x128xf32>
    tpu.vector_store %arg3[%c0_15, %c0_16], %58 {strides = array<i32>} : memref<8x128xf32, #tpu.memory_space<vmem>>, vector<8x128xf32>,
    return
  }
  func.func @transform_0(%arg0: i32) -> (i32, i32) {
    %c0_i32 = arith.constant 0 : i32
    %c0_i32_0 = arith.constant 0 : i32
    return %arg0, %c0_i32 : i32, i32
  }
  func.func @transform_1(%arg0: i32) -> (i32, i32) {
    %c0_i32 = arith.constant 0 : i32
    %c0_i32_0 = arith.constant 0 : i32
    %c0_i32_1 = arith.constant 0 : i32
    return %c0_i32, %c0_i32_0 : i32, i32
  }
  func.func @transform_2(%arg0: i32) -> (i32, i32) {
    %c0_i32 = arith.constant 0 : i32
    %c0_i32_0 = arith.constant 0 : i32
    return %arg0, %c0_i32 : i32, i32
  }
}

</mosaic_0001>

<bundles_post_ra>
// kernel: tpu_custom_call.1
= control target key start
LH: loop header
LB: loop body
LE: loop exit
PB: predicated region body
PF: predicated region fallthrough
CT: control target
= control target key end

     0   :  { %7 = vsyncpa [#allocation3], 0  ;;  %s736_s0 = inlined_call_operand.vmem [shape: f32[100,128], index: 0, kind: input, shape index: {}]   ;;  %s737_s1 = inlined_call_operand.vmem [shape: s32[128,1], index: 1, kind: input, shape index: {}]   ;;  %s738_s2 = inlined_call_operand.hbm [shape: f32[32,128], index: 2, kind: output, shape index: {}]  }
   0x1   :  { %9 = vsyncpa [#allocation3 + $0x1], 0  ;;  %s577_s9 = smov 0   ;;  %s579_s10 = smov 0  }
   0x2   :  { %s581_s11 = smov 0   ;;  %s583_s12 = smov 0  }
   0x3 LB: > { %s598_s13 = sadd.s32 4294967295, %s558_s12   ;;  %s416_s14 = sadd.s32 4294967294, %s558_s12   ;;  %s558_s12 = sphi %s583_s12, %s752_s12   ;;  %s554_s11 = sphi %s581_s11, %s751_s11   ;;  %s550_s10 = sphi %s579_s10, %s750_s10   ;;  %s546_s9 = sphi %s577_s9, %s749_s9  }
   0x4   : > { %s602_s15 = sadd.s32 1, %s558_s12   ;;  %s69_s16 = sadd.s32 1, %s554_s11 }
   0x5   : > { %s66_s17 = ssub.s32 %s558_s12, %s602_s15  ;;  %p79_p0 = scmp.ne.s32.totalorder %s554_s11, %s550_s10 }
   0x6   : > { %p67_p1 = scmp.eq.s32.totalorder %s66_s17, 0  ;;  %p80_p2 = scmp.eq.s32.totalorder %s598_s13, 3 }
   0x7   : > { %p85_p3 = scmp.ne.s32.totalorder %s550_s10, %s546_s9  ;;  %p86_p4 = scmp.eq.s32.totalorder %s416_s14, 3 }
   0x8   : > { %s613_s18 = scalar_select %p67_p1, %s554_s11, %s69_s16  }
   0x9   : > { %p615_p5 = por %p80_p2, %p79_p0  ;;  %p619_p6 = por %p86_p4, %p85_p3 }
   0xa   : > { %p419_p7 = scmp.ge.s32.totalorder %s558_s12, 1  ;;  %p124_p8 = scmp.lt.s32.totalorder %s558_s12, 5 }
   0xc   : > { %p125_p9 = pnand %p419_p7, %p124_p8 }
   0xd   : > { %s421_s21 = sshll.u32 (!%p125_p9), %s598_s13, 2  ;;  %s423_s22 = sshll.u32 (!%p125_p9), %s598_s13, 5  ;;  %v222_v0 = vlaneseq (!%p125_p9)  ;;  %v560_v1 = vmov (!%p125_p9), 0  }
   0xe   : > { %128 = sbr.rel (%p125_p9) target bundleno = 579 (0x243), region = 28  ;;  %p155_p10 = scmp.lt.s32.totalorder (!%p125_p9), %s421_s21, 12  ;;  %471 = vset.pattern.permute.xlu1 (!%p125_p9), %v560_v1  ;;  %v301_v2 = vstv (!%p125_p9), %s423_s22  ;;  %470 = vset.pattern.permute.xlu0 (!%p125_p9), %v560_v1 }
   0xf   : > { %s165_s25 = scalar_lea.vmem (!%p125_p9), %s737_s1, %s423_s22  ;;  %v297_v3 = vshrl.u32 (!%p125_p9), %v222_v0, 7  ;;  %v223_v36 = vand.u32 (!%p125_p9), 127, %v222_v0  ;;  %s147_s30 = sand.u32 (!%p125_p9), 1, %s550_s10  }
  0x10   : > { %v167_v4 = vld [vmem:[%s165_s25 + $0x8] sm:$0xff] (!%p125_p9)  ;;  %v166_v7 = vld [vmem:[%s165_s25] sm:$0xff] (!%p125_p9)  ;;  %v168_v11 = vld [vmem:[%s165_s25 + $0x10] sm:$0xff] (!%p125_p9)  ;;  %s420_s3 = sshll.u32 (!%p125_p9), %s147_s30, 3  ;;  %s425_s6 = sshll.u32 (!%p125_p9), %s598_s13, 7 }
  0x11   : > { %v298_v5 = vadd.s32 (!%p125_p9), 8, %v297_v3  ;;  %v299_v6 = vadd.s32 (!%p125_p9), 16, %v297_v3  ;;  %v302_v8 = vadd.s32 (!%p125_p9), %v301_v2, %v297_v3  ;;  %v300_v9 = vadd.s32 (!%p125_p9), 24, %v297_v3  ;;  %v169_v16 = vld [vmem:[%s165_s25 + $0x18] sm:$0xff] (!%p125_p9)  ;;  %s149_s4 = scalar_lea.vmem (!%p125_p9), [#allocation2], %s420_s3  ;;  %s696_s16 = scalar_lea.hbm (!%p125_p9), %s738_s2, %s425_s6 }
  0x12   : > { %vm311_vm0 = vcmp.ne.s32.totalorder (!%p125_p9), %v167_v4, 4294967196  ;;  %vm310_vm1 = vcmp.ne.s32.totalorder (!%p125_p9), %v166_v7, 4294967196  ;;  %vm312_vm3 = vcmp.ne.s32.totalorder (!%p125_p9), %v168_v11, 4294967196  ;;  %vm313_vm8 = vcmp.ne.s32.totalorder (!%p125_p9), %v169_v16, 4294967196  ;;  %s355_s5 = sshll.u32 (!%p125_p9), %s149_s4, 4  ;;  %s342_s17 = scalar_lea.sflag (!%p125_p9), [#allocation3], %s147_s30  ;;  %s691_s5 = int_to_ptr.vmem [resolvable:$true] %s355_s5 }
  0x13   : > { %v303_v10 = vadd.s32 (!%p125_p9), %v301_v2, %v298_v5  ;;  %v304_v12 = vadd.s32 (!%p125_p9), %v301_v2, %v299_v6  ;;  %vm306_vm2 = vcmp.lt.s32.totalorder (!%p125_p9), %v302_v8, 100  ;;  %v305_v13 = vadd.s32 (!%p125_p9), %v301_v2, %v300_v9  ;;  %s561_s13 = smov (!%p125_p9), [#allocation2]  }
  0x14   : > { %vm637_vm6 = vmand (!%p125_p9), %vm306_vm2, %vm310_vm1  ;;  %s500_s22 = sshll.u32 (!%p125_p9), %s561_s13, 4  ;;  %s501_s22 = int_to_ptr.vmem [resolvable:$false] %s500_s22 }
  0x15   : > { %s754_s21 = smov (!%p155_p10, %s421_s21), 12  ;;  %vm307_vm4 = vcmp.lt.s32.totalorder %v303_v10, 100  ;;  %vm308_vm5 = vcmp.lt.s32.totalorder %v304_v12, 100  ;;  %vm309_vm7 = vcmp.lt.s32.totalorder %v305_v13, 100  ;;  %s502_s23 = scalar_lea.vmem %s501_s22, 256 }
  0x16   : > { %s422_s26 = sshll.u32 %s754_s21, 3  ;;  %vm642_vm9 = vmand %vm307_vm4, %vm311_vm0  ;;  %vm322_vm0 = vcmask 7168   ;;  %s496_s21 = scalar_lea.vmem %s691_s5, 128 }
  0x17   : > { %s158_s29 = scalar_lea.vmem %s736_s0, %s422_s26  ;;  %vm646_vm10 = vmand %vm308_vm5, %vm312_vm3  ;;  %p497_p11 = scmp.ne.s32.totalorder %s691_s5, %s496_s21 }
  0x18   : > { %v633_v14 = vld [vmem:[%s158_s29] sm:$0xff]  ;;  %v172_v15 = vld [vmem:[%s158_s29 + $0x10] sm:$0xff]  ;;  %v171_v18 = vld [vmem:[%s158_s29 + $0x8] sm:$0xff]  ;;  %p503_p0 = scmp.lt.s32.totalorder %s691_s5, %s501_s22  ;;  %p504_p1 = scmp.lt.s32.totalorder %s502_s23, %s496_s21 }
  0x19   : > { %174 = vmax.xlane.f32.xlu0 %v633_v14  ;;  %178 = vmax.xlane.f32.xlu1 %v172_v15  ;;  %v173_v19 = vld [vmem:[%s158_s29 + $0x18] sm:$0xff]  ;;  %vm650_vm11 = vmand %vm309_vm7, %vm313_vm8  ;;  %p498_p12 = pnand %p497_p11, %p615_p5 }
  0x1a   : > { %p505_p2 = por %p504_p1, %p503_p0 }
  0x1b   : > { %p499_p13 = pneg %p498_p12 }
  0x1d   : > { %176 = vmax.xlane.f32.xlu0 %v171_v18  ;;  %180 = vmax.xlane.f32.xlu1 %v173_v19  ;;  %p506_p3 = pnand %p505_p2, %p499_p13 }
  0x2e   : > { %228 = vperm.xlu1 %471, %v167_v4  }
  0x32   : > { %231 = vperm.xlu1 %471, %v168_v11  }
  0x33   : > { %225 = vperm.xlu0 %470, %v166_v7  }
  0x36   : > { %234 = vperm.xlu1 %471, %v169_v16  }
  0xa6   : > { %v654_v23 = vpop.xlane.xlu0 %174  ;;  %v656_v24 = vpop.xlane.xlu1 %178 }
  0xa7   : > { %v198_v25 = vsub.f32 %v633_v14, %v654_v23  ;;  %v200_v26 = vsub.f32 %v172_v15, %v656_v24  ;;  %v182_v48 = vsub.f32 -inf, %v654_v23  ;;  %v184_v49 = vsub.f32 -inf, %v656_v24 }
  0xa9   : > { %v202_v27 = vmul.f32 1.442695, %v198_v25  ;;  %v206_v28 = vmul.f32 1.442695, %v200_v26  ;;  %v186_v50 = vmul.f32 1.442695, %v182_v48 }
  0xaa   : > { %v661_v29 = vpop.xlane.xlu0 %176  ;;  %v663_v30 = vpop.xlane.xlu1 %180  ;;  %v190_v52 = vmul.f32 1.442695, %v184_v49 }
  0xab   : > { %v199_v31 = vsub.f32 %v171_v18, %v661_v29  ;;  %472 = vpow2.f32 %v202_v27  ;;  %v201_v32 = vsub.f32 %v173_v19, %v663_v30  ;;  %v183_v51 = vsub.f32 -inf, %v661_v29 }
  0xac   : > { %474 = vpow2.f32 %v206_v28  ;;  %v185_v54 = vsub.f32 -inf, %v663_v30 }
  0xad   : > { %v204_v33 = vmul.f32 1.442695, %v199_v31  ;;  %v208_v34 = vmul.f32 1.442695, %v201_v32  ;;  %v188_v53 = vmul.f32 1.442695, %v183_v51 }
  0xae   : > { %v229_v35 = vpop.permute.xlu1 %228  ;;  %v192_v55 = vmul.f32 1.442695, %v185_v54 }
  0xaf   : > { %476 = vpow2.f32 %v204_v33  ;;  %vm237_vm14 = vcmp.eq.s32.totalorder %v223_v36, %v229_v35 }
  0xb0   : > { %478 = vpow2.f32 %v208_v34  ;;  %v241_v45 = vsel %vm237_vm14, %v171_v18, 0.0 }
  0xb1   : > { %480 = vpow2.f32 %v186_v50 }
  0xb2   : > { %v232_v39 = vpop.permute.xlu1 %231  ;;  %v226_v41 = vpop.permute.xlu0 %225  ;;  %482 = vpow2.f32 %v190_v52 }
  0xb3   : > { %vm238_vm12 = vcmp.eq.s32.totalorder %v223_v36, %v232_v39  ;;  %vm236_vm13 = vcmp.eq.s32.totalorder %v223_v36, %v226_v41  ;;  %484 = vpow2.f32 %v188_v53 }
  0xb4   : > { %v242_v43 = vsel %vm238_vm12, %v172_v15, 0.0  ;;  %v240_v44 = vsel %vm236_vm13, %v633_v14, 0.0  ;;  %486 = vpow2.f32 %v192_v55 }
  0xb5   : > { %v473_v37 = vpop.eup %472 }
  0xb6   : > { %210 = vadd.xlane.f32.xlu1 %v473_v37  ;;  %v475_v38 = vpop.eup %474  ;;  %v235_v46 = vpop.permute.xlu1 %234 }
  0xb7   : > { %vm239_vm15 = vcmp.eq.s32.totalorder %v223_v36, %v235_v46 }
  0xb8   : > { %v243_v47 = vsel %vm239_vm15, %v173_v19, 0.0 }
  0xb9   : > { %v477_v40 = vpop.eup %476 }
  0xba   : > { %214 = vadd.xlane.f32.xlu1 %v475_v38  ;;  %212 = vadd.xlane.f32.xlu0 %v477_v40  ;;  %v479_v42 = vpop.eup %478 }
  0xbb   : > { %v481_v56 = vpop.eup %480 }
  0xbc   : > { %v483_v57 = vpop.eup %482  ;;  %v194_v58 = vmul.f32 0.0, %v481_v56 }
  0xbd   : > { %v485_v59 = vpop.eup %484  ;;  %v196_v62 = vmul.f32 0.0, %v483_v57 }
  0xbe   : > { %216 = vadd.xlane.f32.xlu1 %v479_v42  ;;  %248 = vadd.xlane.f32.xlu0 %v242_v43  ;;  %v195_v63 = vmul.f32 0.0, %v485_v59  ;;  %v487_v0 = vpop.eup %486 }
  0xbf   : > { %v197_v5 = vmul.f32 0.0, %v487_v0 }
  0xc2   : > { %244 = vadd.xlane.f32.xlu1 %v240_v44  ;;  %258 = vadd.xlane.f32.xlu0 %v171_v18 }
  0xc6   : > { %246 = vadd.xlane.f32.xlu1 %v241_v45  ;;  %260 = vadd.xlane.f32.xlu0 %v172_v15 }
  0xca   : > { %256 = vadd.xlane.f32.xlu1 %v633_v14 }
  0xce   : > { %250 = vadd.xlane.f32.xlu1 %v243_v47 }
  0xd2   : > { %262 = vadd.xlane.f32.xlu1 %v173_v19 }
 0x143   : > { %v211_v60 = vpop.xlane.xlu1 %210 }
 0x144   : > { %v218_v61 = vadd.f32 %v211_v60, %v194_v58 }
 0x146   : > { %488 = vlog2.f32 %v218_v61 }
 0x147   : > { %v215_v1 = vpop.xlane.xlu1 %214  ;;  %v213_v2 = vpop.xlane.xlu0 %212 }
 0x148   : > { %v220_v3 = vadd.f32 %v215_v1, %v196_v62  ;;  %v219_v4 = vadd.f32 %v213_v2, %v195_v63 }
 0x14a   : > { %490 = vlog2.f32 %v220_v3 }
 0x14b   : > { %492 = vlog2.f32 %v219_v4  ;;  %v217_v6 = vpop.xlane.xlu1 %216  ;;  %v249_v7 = vpop.xlane.xlu0 %248 }
 0x14c   : > { %v221_v8 = vadd.f32 %v217_v6, %v197_v5  ;;  %v282_v28 = vmul.f32 0.9, %v249_v7 }
 0x14e   : > { %494 = vlog2.f32 %v221_v8 }
 0x14f   : > { %v245_v9 = vpop.xlane.xlu1 %244  ;;  %v259_v10 = vpop.xlane.xlu0 %258 }
 0x150   : > { %v489_v11 = vpop.eup %488  ;;  %v280_v26 = vmul.f32 0.9, %v245_v9  ;;  %v289_v31 = vmul.f32 0.00078125, %v259_v10 }
 0x151   : > { %v269_v12 = vmul.f32 0.6931472, %v489_v11 }
 0x153   : > { %v247_v13 = vpop.xlane.xlu1 %246  ;;  %v276_v15 = vadd.f32 %v269_v12, %v654_v23  ;;  %v261_v16 = vpop.xlane.xlu0 %260 }
 0x154   : > { %v491_v14 = vpop.eup %490  ;;  %v290_v33 = vmul.f32 0.00078125, %v261_v16  ;;  %v281_v37 = vmul.f32 0.9, %v247_v13 }
 0x155   : > { %v493_v18 = vpop.eup %492  ;;  %v273_v19 = vmul.f32 0.6931472, %v491_v14  ;;  %v284_v35 = vsub.f32 %v276_v15, %v280_v26 }
 0x156   : > { %v271_v25 = vmul.f32 0.6931472, %v493_v18 }
 0x157   : > { %v278_v27 = vadd.f32 %v273_v19, %v656_v24  ;;  %v257_v32 = vpop.xlane.xlu1 %256 }
 0x158   : > { %v495_v34 = vpop.eup %494  ;;  %v277_v36 = vadd.f32 %v271_v25, %v661_v29  ;;  %v288_v38 = vmul.f32 0.00078125, %v257_v32 }
 0x159   : > { %v275_v39 = vmul.f32 0.6931472, %v495_v34  ;;  %v286_v40 = vsub.f32 %v278_v27, %v282_v28 }
 0x15a   : > { %v285_v23 = vsub.f32 %v277_v36, %v281_v37  ;;  %v292_v41 = vsub.f32 %v284_v35, %v288_v38 }
 0x15b   : > { %v294_v42 = vsub.f32 %v286_v40, %v290_v33  ;;  %v251_v43 = vpop.xlane.xlu1 %250  ;;  %v279_v45 = vadd.f32 %v275_v39, %v663_v30 }
 0x15c   : > { %v293_v44 = vsub.f32 %v285_v23, %v289_v31  ;;  %v318_v24 = vsel %vm637_vm6, %v292_v41, 0.0  ;;  %v283_v46 = vmul.f32 0.9, %v251_v43 }
 0x15d   : > { %v323_v47 = vsel %vm322_vm0, %v318_v24, 0.0  ;;  %v320_v48 = vsel %vm646_vm10, %v294_v42, 0.0 }
 0x15e   : > { %v319_v29 = vsel %vm642_vm9, %v293_v44, 0.0  ;;  %v287_v51 = vsub.f32 %v279_v45, %v283_v46  ;;  %v326_v17 = vsel %vm322_vm0, %v320_v48, 0.0 }
 0x15f   : > { %v324_v49 = vsel %vm322_vm0, %v319_v29, 0.0  ;;  %v263_v50 = vpop.xlane.xlu1 %262 }
 0x160   : > { %v291_v52 = vmul.f32 0.00078125, %v263_v50  ;;  %v325_v53 = vadd.f32 %v324_v49, %v323_v47 }
 0x162   : > { %v295_v54 = vsub.f32 %v287_v51, %v291_v52  ;;  %v327_v30 = vadd.f32 %v326_v17, %v325_v53 }
 0x164   : > { %v321_v55 = vsel %vm650_vm11, %v295_v54, 0.0 }
 0x165   : > { %v328_v20 = vsel %vm322_vm0, %v321_v55, 0.0 }
 0x166   : > { %v329_v56 = vadd.f32 %v328_v20, %v327_v30 }
 0x168   : > { %330 = vadd.xlane.f32.xlu0 %v329_v56 }
 0x1f5   : > { %v331_v21 = vpop.xlane.xlu0 %330 }
 0x1f6   : > { %v332_v57 = vrot.slane %v331_v21, 4 }
 0x1f8   : > { %v333_v58 = vadd.f32 %v332_v57, %v331_v21 }
 0x1fa   : > { %v334_v59 = vrot.slane %v333_v58, 2 }
 0x1fc   : > { %v335_v60 = vadd.f32 %v334_v59, %v333_v58 }
 0x1fe   : > { %v336_v61 = vrot.slane %v335_v60, 1 }
 0x200   : > { %v337_v62 = vadd.f32 %v336_v61, %v335_v60 }
 0x202   : > { %428 = vpush %v337_v62 }
 0x233   : > { %s429_s7 = spop %428 }
 0x234   : > { %v339_v22 = vstv %s429_s7 }
 0x235   : > { %340 = vst [vmem:[%s149_s4] sm:$0xff] %v339_v22 }
 0x236   : > { %509 = shalt.err (!%p506_p3)
}
 0x237   : > { %s510_s24 = scalar_lea.hbm %s696_s16, 128  ;;  %s514_s27 = scalar_lea.hbm %s738_s2, 512 }
 0x238   : > { %p511_p4 = scmp.ne.s32.totalorder %s696_s16, %s510_s24  ;;  %p515_p9 = scmp.lt.u32.totalorder %s696_s16, %s738_s2 }
 0x239   : > { %p516_p10 = scmp.lt.u32.totalorder %s514_s27, %s510_s24  ;;  %p518_p12 = scmp.lt.u32.totalorder %s510_s24, %s696_s16 }
 0x23a   : > { %p512_p7 = pnand %p511_p4, %p615_p5 }
 0x23b   : > { %p517_p11 = por %p516_p10, %p515_p9 }
 0x23c   : > { %p513_p8 = pneg %p512_p7 }
 0x23d   : > { %p519_p13 = por %p518_p12, %p517_p11 }
 0x23f   : > { %p520_p0 = pnand %p519_p13, %p513_p8 }
 0x241   : > { %523 = shalt.err (!%p520_p0)
}
 0x242   : > { %430 = dma.vmem_to_hbm [thread:$0]  (%p615_p5), %s691_s5, 128, %s696_s16, %s342_s17  }
 0x243 PF: > { %p436_p1 = scmp.ge.s32.totalorder %s558_s12, 2  ;;  %s367_s30 = sand.u32 1, %s546_s9  }
 0x244   : > { %s368_s3 = scalar_lea.sflag [#allocation3], %s367_s30 }
 0x245   : > { %p433_p2 = pnand %p436_p1, %p619_p6 }
 0x247   : > { %541 = dma.done.wait (!%p433_p2), %s368_s3, 128  }
 0x248   : > { %543 = vsyncadd (!%p433_p2), %s368_s3, 4294967168  ;;  %p12_p3 = scmp.ge.s32.totalorder %s602_s15, 6   ;;  %s749_s9 = smov %s550_s10 }
 0x249   : > { %s750_s10 = smov %s554_s11  ;;  %s751_s11 = smov %s613_s18 }
 0x24a   : > { %s752_s12 = smov %s602_s15  ;;  %14 = sbr.rel (!%p12_p3) target bundleno = 3 (0x3), region = 64 }
 0x251   :  { %373 = vsyncpa [#allocation3], 1 }
 0x252   :  { %375 = vsyncpa [#allocation3 + $0x1], 1 }

</bundles_post_ra>
